<compile_context>
chip_gen: v7x
topology: tpu7x:2x2x1
jax: 0.10.0
libtpu: 0.0.40
codegen_flags: <defaults>
</compile_context>

<pallas_src>
import functools

import jax
import jax.numpy as jnp
from jax import lax
from jax.experimental import pallas as pl
from jax.experimental.pallas import tpu as pltpu

IN_FEAT = 128
EMBED = 256
NUM_PRED = 19            # 1 centerness + 6 distance + 2 angle + 10 cls
NUM_PRED_PAD = 128       # lane-dense prediction width (sliced to 19 in JAX)
NUM_HEADS = 8
HEAD_DIM = EMBED // NUM_HEADS
FFN_DIM = 512
NUM_LAYERS = 2           # decoder.num_layers (small, synthetic config)
QUERY_POS_DIM = 9        # cat([distance(6), ref_points(3)])
QUERY_POS_PAD = 16
LN_EPS = 1e-5
NEG_INF = -1e9
LANES = 128


# ------------------------------ kernel helpers ------------------------------

def _bf16(x):
    return x.astype(jnp.bfloat16)


def _layernorm(y, g, b):
    mu = jnp.mean(y, axis=-1, keepdims=True)
    yc = y - mu
    var = jnp.mean(yc * yc, axis=-1, keepdims=True)
    return (yc * lax.rsqrt(var + LN_EPS)) * g + b


def _mha_blockdiag(q, k, v, bias, num_heads):
    """Multi-head attention via block-diagonal head masking.

    q: (Nq, C) f32, already scaled by 1/sqrt(dh).
    k, v: (Nk, C) bf16.
    bias: None or (1, Nk) f32 additive key-padding bias.
    Returns (Nq, C) f32.

    Per-head queries are stacked along rows with out-of-head channels zeroed,
    so one nt score matmul + one PV matmul covers every head (no per-head lane
    slices / transposes / concat).
    """
    nq, c = q.shape
    dh = c // num_heads
    ch = lax.broadcasted_iota(jnp.int32, (num_heads, c), 1)
    hh = lax.broadcasted_iota(jnp.int32, (num_heads, c), 0)
    head_mask = (ch // dh == hh).astype(jnp.float32)          # (H, C)

    # (H*Nq, C): row (h, i) holds q[i] restricted to head h's channels.
    q2 = _bf16((q[None, :, :] * head_mask[:, None, :]).reshape(num_heads * nq, c))
    # scores: contract channels; zeroed channels restrict the sum to head h.
    s = lax.dot_general(q2, k, (((1,), (1,)), ((), ())),
                        preferred_element_type=jnp.float32)   # (H*Nq, Nk)
    if bias is not None:
        s = s + bias
    m = jnp.max(s, axis=-1, keepdims=True)
    p = jnp.exp(s - m)
    l = jnp.sum(p, axis=-1, keepdims=True)
    o = jnp.dot(_bf16(p), v, preferred_element_type=jnp.float32)   # (H*Nq, C)
    o = o * pl.reciprocal(l, approx=True)        # normalize after the PV matmul
    o = o.reshape(num_heads, nq, c)
    # keep every row's own head channels and reduce over heads -> (Nq, C)
    return jnp.sum(o * head_mask[:, None, :], axis=0)


# ------------------------------ Pallas kernels ------------------------------

def _stem_kernel(x_ref, wu_ref, bu_ref, wp_ref, bp_ref, feat_ref, pred_ref):
    # upsample_layer (Conv1d 128->256, k=1) followed by conv_preds[0].
    up = (jnp.dot(_bf16(x_ref[0]), wu_ref[...],
                  preferred_element_type=jnp.float32) + bu_ref[...])
    feat_ref[0] = up.astype(feat_ref.dtype)
    preds = (jnp.dot(_bf16(up), wp_ref[...],
                     preferred_element_type=jnp.float32) + bp_ref[...])
    pred_ref[0] = preds.astype(pred_ref.dtype)


def _decoder_layer_kernel(
        q_ref, qpos_ref, feat_ref, bias_ref,
        wqp_ref, bqp_ref,
        wqk_ref, bqk_ref, wv_ref, bv_ref, wo1_ref, bo1_ref, g1_ref, be1_ref,
        wq_ref, bq_ref, wkv_ref, bkv_ref, wo2_ref, bo2_ref, g2_ref, be2_ref,
        w1_ref, b1_ref, w2_ref, b2_ref, g3_ref, be3_ref,
        wp_ref, bp_ref,
        qout_ref, pout_ref, *, num_heads):
    x = q_ref[0].astype(jnp.float32)                           # (Nq, C)
    c = x.shape[-1]
    scale = 1.0 / float(c // num_heads) ** 0.5

    # learned projection of the (padded) 9-d query_pos to the embed dim,
    # shared by the self- and cross-attention with_pos_embed additions.
    qpos = (jnp.dot(_bf16(qpos_ref[0]), wqp_ref[...],
                    preferred_element_type=jnp.float32) + bqp_ref[...])

    # ---- self-attention: fused Q|K projection, V from the raw query --------
    qk = (jnp.dot(_bf16(x + qpos), wqk_ref[...],
                  preferred_element_type=jnp.float32) + bqk_ref[...])
    q = qk[:, :c] * scale                                      # scale folded once
    k = _bf16(qk[:, c:])
    v = _bf16(jnp.dot(_bf16(x), wv_ref[...],
                      preferred_element_type=jnp.float32) + bv_ref[...])
    attn = _mha_blockdiag(q, k, v, None, num_heads)
    y = (jnp.dot(_bf16(attn), wo1_ref[...],
                 preferred_element_type=jnp.float32) + bo1_ref[...] + x)
    x = _layernorm(y, g1_ref[...], be1_ref[...])

    # ---- cross-attention over flattened image features: fused K|V proj -----
    feat = feat_ref[0]                                         # (Nk, C) bf16
    bias = bias_ref[0]                                         # (1, Nk) f32
    qc = (jnp.dot(_bf16(x + qpos), wq_ref[...],
                  preferred_element_type=jnp.float32) + bq_ref[...]) * scale
    kv = (jnp.dot(feat, wkv_ref[...],
                  preferred_element_type=jnp.float32) + bkv_ref[...])
    kc = _bf16(kv[:, :c])
    vc = _bf16(kv[:, c:])
    attn = _mha_blockdiag(qc, kc, vc, bias, num_heads)
    y = (jnp.dot(_bf16(attn), wo2_ref[...],
                 preferred_element_type=jnp.float32) + bo2_ref[...] + x)
    x = _layernorm(y, g2_ref[...], be2_ref[...])

    # ---- FFN + residual + LayerNorm ----------------------------------------
    h = jnp.maximum(jnp.dot(_bf16(x), w1_ref[...],
                            preferred_element_type=jnp.float32) + b1_ref[...],
                    0.0)
    y = (jnp.dot(_bf16(h), w2_ref[...],
                 preferred_element_type=jnp.float32) + b2_ref[...] + x)
    x = _layernorm(y, g3_ref[...], be3_ref[...])
    qout_ref[0] = x.astype(qout_ref.dtype)

    # ---- conv_preds[i+1] (lane-dense padded output, sliced to 19 in JAX) ----
    preds = (jnp.dot(_bf16(x), wp_ref[...],
                     preferred_element_type=jnp.float32) + bp_ref[...])
    pout_ref[0] = preds.astype(pout_ref.dtype)


# ------------------------------ pallas wrappers ------------------------------

def _const_spec(shape):
    nd = len(shape)
    return pl.BlockSpec(shape, lambda b, nd=nd: (0,) * nd)


def fused_stem(features, wu, bu, wp, bp):
    B, N, K = features.shape
    C = wu.shape[1]
    NP = wp.shape[1]
    return pl.pallas_call(
        _stem_kernel,
        out_shape=(jax.ShapeDtypeStruct((B, N, C), jnp.float32),
                   jax.ShapeDtypeStruct((B, N, NP), jnp.float32)),
        grid=(B,),
        in_specs=[pl.BlockSpec((1, N, K), lambda b: (b, 0, 0)),
                  _const_spec(wu.shape), _const_spec(bu.shape),
                  _const_spec(wp.shape), _const_spec(bp.shape)],
        out_specs=(pl.BlockSpec((1, N, C), lambda b: (b, 0, 0)),
                   pl.BlockSpec((1, N, NP), lambda b: (b, 0, 0))),
        compiler_params=pltpu.CompilerParams(
            dimension_semantics=("parallel",)),
    )(features, wu, bu, wp, bp)


_LAYER_WEIGHT_KEYS = (
    ('query_pos', 'w'), ('query_pos', 'b'),
    ('self_qk', 'w'), ('self_qk', 'b'),
    ('self_v', 'w'), ('self_v', 'b'),
    ('self_o', 'w'), ('self_o', 'b'),
    ('norm1_g', None), ('norm1_b', None),
    ('cross_q', 'w'), ('cross_q', 'b'),
    ('cross_kv', 'w'), ('cross_kv', 'b'),
    ('cross_o', 'w'), ('cross_o', 'b'),
    ('norm2_g', None), ('norm2_b', None),
    ('ffn1', 'w'), ('ffn1', 'b'),
    ('ffn2', 'w'), ('ffn2', 'b'),
    ('norm3_g', None), ('norm3_b', None),
    ('pred', 'w'), ('pred', 'b'),
)


def _layer_weights(lp):
    return [lp[k] if sub is None else lp[k][sub] for k, sub in _LAYER_WEIGHT_KEYS]


def fused_decoder_layer(query, qpos, feat_bf16, key_bias, lp):
    B, Nq, C = query.shape
    Nk = feat_bf16.shape[1]
    Pq = qpos.shape[-1]
    NP = lp['pred']['w'].shape[1]
    weights = _layer_weights(lp)
    kernel = functools.partial(_decoder_layer_kernel, num_heads=NUM_HEADS)
    in_specs = [pl.BlockSpec((1, Nq, C), lambda b: (b, 0, 0)),
                pl.BlockSpec((1, Nq, Pq), lambda b: (b, 0, 0)),
                pl.BlockSpec((1, Nk, C), lambda b: (b, 0, 0)),
                pl.BlockSpec((1, 1, Nk), lambda b: (b, 0, 0))]
    in_specs += [_const_spec(w.shape) for w in weights]
    return pl.pallas_call(
        kernel,
        out_shape=(jax.ShapeDtypeStruct((B, Nq, C), jnp.float32),
                   jax.ShapeDtypeStruct((B, Nq, NP), jnp.float32)),
        grid=(B,),
        in_specs=in_specs,
        out_specs=(pl.BlockSpec((1, Nq, C), lambda b: (b, 0, 0)),
                   pl.BlockSpec((1, Nq, NP), lambda b: (b, 0, 0))),
        compiler_params=pltpu.CompilerParams(
            dimension_semantics=("parallel",)),
    )(query, qpos, feat_bf16, key_bias, *weights)


# ----------------------------- parameter setup ------------------------------

def _dense(key, fan_in, fan_out, pad_in=None, pad_out=None):
    w = jax.random.normal(key, (fan_in, fan_out), jnp.float32) * 0.02
    b = jnp.zeros((fan_out,), jnp.float32)
    if pad_out is not None and pad_out > fan_out:
        w = jnp.pad(w, ((0, 0), (0, pad_out - fan_out)))
        b = jnp.pad(b, (0, pad_out - fan_out))
    if pad_in is not None and pad_in > fan_in:
        w = jnp.pad(w, ((0, pad_in - fan_in), (0, 0)))
    # matmul weights stored in bf16 (MXU-native); biases stay f32.
    return {'w': w.astype(jnp.bfloat16), 'b': b.reshape(1, -1)}


def init_params(key, num_layers=NUM_LAYERS):
    keys = iter(jax.random.split(key, 64))
    params = {
        # self.upsample_layer = nn.Conv1d(128, 256, kernel_size=1)
        'upsample': _dense(next(keys), IN_FEAT, EMBED),
        # self.conv_preds[0] = nn.Conv1d(256, 19, kernel_size=1)  (lane-padded)
        'conv_pred0': _dense(next(keys), EMBED, NUM_PRED, pad_out=NUM_PRED_PAD),
    }
    layers = []
    for _ in range(num_layers):
        lp = {
            # TODO(synk): build_transformer_layer(decoder) config is external;
            # a standard (self_attn, norm, cross_attn, norm, ffn, norm) layer
            # with a learned 9->256 projection of query_pos is used.
            'query_pos': _dense(next(keys), QUERY_POS_DIM, EMBED,
                                pad_in=QUERY_POS_PAD),
            # self-attn: Q and K share the input (query+pos) -> fused (C, 2C).
            'self_qk': _dense(next(keys), EMBED, 2 * EMBED),
            'self_v': _dense(next(keys), EMBED, EMBED),
            'self_o': _dense(next(keys), EMBED, EMBED),
            # cross-attn: K and V share the input (feat_flatten) -> fused.
            'cross_q': _dense(next(keys), EMBED, EMBED),
            'cross_kv': _dense(next(keys), EMBED, 2 * EMBED),
            'cross_o': _dense(next(keys), EMBED, EMBED),
            'ffn1': _dense(next(keys), EMBED, FFN_DIM),
            'ffn2': _dense(next(keys), FFN_DIM, EMBED),
            # conv_preds[i+1] (lane-padded to 128)
            'pred': _dense(next(keys), EMBED, NUM_PRED, pad_out=NUM_PRED_PAD),
            'norm1_g': jnp.ones((1, EMBED), jnp.float32),
            'norm1_b': jnp.zeros((1, EMBED), jnp.float32),
            'norm2_g': jnp.ones((1, EMBED), jnp.float32),
            'norm2_b': jnp.zeros((1, EMBED), jnp.float32),
            'norm3_g': jnp.ones((1, EMBED), jnp.float32),
            'norm3_b': jnp.zeros((1, EMBED), jnp.float32),
        }
        layers.append(lp)
    params['decoder'] = layers
    return params


# -------------------------------- model glue --------------------------------

def split_pred(preds_padded, base_xyz):
    # preds_padded: (B, N, 128); only the first 19 lanes are real predictions.
    preds = preds_padded[..., :NUM_PRED]
    results = {}
    results['centerness'] = preds[..., 0:1]
    distance = jnp.exp(preds[..., 1:7])
    results['distance'] = distance
    angle = preds[..., 7:9]
    results['bbox_pred'] = jnp.concatenate([distance, angle], axis=-1)
    results['cls_scores'] = preds[..., 9:19]
    results['ref_points'] = base_xyz
    return results


def _nearest_resize(mask2d, out_h, out_w):
    in_h, in_w = mask2d.shape
    ys = (jnp.arange(out_h) * in_h) // out_h
    xs = (jnp.arange(out_w) * in_w) // out_w
    return mask2d[ys][:, xs]


def prepare_decoder_inputs(mlvl_feats, img_metas):
    # TODO(synk): reference_points / spatial_shapes / level_start_index /
    # valid_ratios feed MultiScaleDeformableAttention in the original decoder;
    # the dense masked cross-attention replacement only consumes the flattened
    # features and the key-padding mask, so those tensors are not materialized.
    B = mlvl_feats[0].shape[0]
    in_h, in_w = img_metas[0]['batch_input_shape']
    img_masks = jnp.ones((B, in_h, in_w), jnp.float32)
    for b in range(B):
        h, w, _ = img_metas[b]['img_shape']
        img_masks = img_masks.at[b, :h, :w].set(0.0)
    feat_flatten, mask_flatten = [], []
    for feat in mlvl_feats:
        bs, c, fh, fw = feat.shape
        m = jnp.stack([_nearest_resize(img_masks[b], fh, fw) for b in range(B)], 0)
        feat_flatten.append(feat.reshape(bs, c, fh * fw).transpose(0, 2, 1))
        mask_flatten.append((m > 0.5).reshape(bs, fh * fw))
    feat_flatten = jnp.concatenate(feat_flatten, axis=1)     # (B, sum HW, C)
    mask_flatten = jnp.concatenate(mask_flatten, axis=1)     # (B, sum HW) bool
    return feat_flatten, mask_flatten


def ca_head_iter_forward(params, select_points, img_dict):
    points, features, _ = select_points                      # (B,N,3), (B,N,128)
    # fused: upsample Conv1d(128->256) + conv_preds[0]
    feat, preds0 = fused_stem(features,
                              params['upsample']['w'], params['upsample']['b'],
                              params['conv_pred0']['w'], params['conv_pred0']['b'])
    decode_res = split_pred(preds0, points)
    decode_res_all = [decode_res]

    feat_flatten, mask_flatten = prepare_decoder_inputs(
        img_dict['img_features'], img_dict['img_metas'])
    B, Nk, _ = feat_flatten.shape
    nk_pad = ((Nk + LANES - 1) // LANES) * LANES
    # lane-dense key axis: zero-pad features, -inf-pad the additive bias.
    feat_pad = jnp.pad(feat_flatten, ((0, 0), (0, nk_pad - Nk), (0, 0)))
    feat_bf16 = feat_pad.astype(jnp.bfloat16)
    key_bias = jnp.where(mask_flatten, NEG_INF, 0.0).astype(jnp.float32)
    key_bias = jnp.pad(key_bias, ((0, 0), (0, nk_pad - Nk)),
                       constant_values=NEG_INF).reshape(B, 1, nk_pad)

    query = feat
    for lp in params['decoder']:
        query_pos = lax.stop_gradient(jnp.concatenate(
            [decode_res['distance'], decode_res['ref_points']], axis=-1))
        query_pos = jnp.pad(query_pos,
                            ((0, 0), (0, 0), (0, QUERY_POS_PAD - QUERY_POS_DIM)))
        query, preds = fused_decoder_layer(query, query_pos, feat_bf16,
                                           key_bias, lp)
        decode_res = split_pred(preds, points)
        decode_res_all.append(decode_res)
    return decode_res_all


# ----------------------------------- main ------------------------------------

if __name__ == "__main__":
    key = jax.random.PRNGKey(0)
    kp, k1, k2, k3, k4 = jax.random.split(key, 5)
    B, Npts = 2, 64
    params = init_params(kp)

    points = jax.random.uniform(k1, (B, Npts, 3), jnp.float32,
                                minval=-2.0, maxval=2.0)
    features = jax.random.normal(k2, (B, Npts, IN_FEAT), jnp.float32)
    img_feat_l0 = jax.random.normal(k3, (B, EMBED, 16, 16), jnp.float32)  # NCHW
    img_feat_l1 = jax.random.normal(k4, (B, EMBED, 8, 8), jnp.float32)    # NCHW
    img_metas = [dict(img_shape=(32, 32, 3), batch_input_shape=(32, 32))
                 for _ in range(B)]
    img_dict = dict(img_features=[img_feat_l0, img_feat_l1],
                    img_metas=img_metas)

    preds_all = ca_head_iter_forward(params, (points, features, None), img_dict)
    for leaf in jax.tree_util.tree_leaves(preds_all):
        jax.block_until_ready(leaf)
    print("KERNEL_OK")
</pallas_src>

<mosaic_0001>
module attributes {stable_mosaic.version = 11 : i64} {
  func.func @_stem_kernel(%arg0: i32, %arg1: memref<1x64x128xf32, #tpu.memory_space<vmem>>, %arg2: memref<128x256xbf16, #tpu.memory_space<vmem>>, %arg3: memref<1x256xf32, #tpu.memory_space<vmem>>, %arg4: memref<256x128xbf16, #tpu.memory_space<vmem>>, %arg5: memref<1x128xf32, #tpu.memory_space<vmem>>, %arg6: memref<1x64x256xf32, #tpu.memory_space<vmem>>, %arg7: memref<1x64x128xf32, #tpu.memory_space<vmem>>) attributes {dimension_semantics = [#tpu.dimension_semantics<parallel>], iteration_bounds = array<i64: 2>, scalar_prefetch = 0 : i64, scratch_operands = 0 : i64, tpu.core_type = #tpu.core_type<tc>, window_params = [{transform_indices = @transform_0, window_bounds = array<i64: 1, 64, 128>}, {pipeline_mode = #tpu.pipeline_mode<synchronous>, transform_indices = @transform_1, window_bounds = array<i64: 128, 256>}, {pipeline_mode = #tpu.pipeline_mode<synchronous>, transform_indices = @transform_2, window_bounds = array<i64: 1, 256>}, {pipeline_mode = #tpu.pipeline_mode<synchronous>, transform_indices = @transform_3, window_bounds = array<i64: 256, 128>}, {pipeline_mode = #tpu.pipeline_mode<synchronous>, transform_indices = @transform_4, window_bounds = array<i64: 1, 128>}, {transform_indices = @transform_5, window_bounds = array<i64: 1, 64, 256>}, {transform_indices = @transform_6, window_bounds = array<i64: 1, 64, 128>}]} {
    %c0 = arith.constant 0 : index
    %c0_0 = arith.constant 0 : index
    %c0_1 = arith.constant 0 : index
    %0 = vector.load %arg1[%c0, %c0_0, %c0_1] : memref<1x64x128xf32, #tpu.memory_space<vmem>>, vector<1x64x128xf32>
    %1 = vector.shape_cast %0 : vector<1x64x128xf32> to vector<64x128xf32>
    %2 = arith.truncf %1 : vector<64x128xf32> to vector<64x128xbf16>
    %c0_2 = arith.constant 0 : index
    %c0_3 = arith.constant 0 : index
    %3 = vector.load %arg2[%c0_2, %c0_3] : memref<128x256xbf16, #tpu.memory_space<vmem>>, vector<128x256xbf16>
    %cst = arith.constant dense<0.000000e+00> : vector<64x256xf32>
    %4 = tpu.matmul %2, %3, %cst {dimension_numbers = #tpu.dot_dimension_numbers<[1], [0], [0], [1], [0, 0, 1, 1], [], []>} : vector<64x128xbf16>, vector<128x256xbf16>, vector<64x256xf32> -> vector<64x256xf32>
    %c0_4 = arith.constant 0 : index
    %c0_5 = arith.constant 0 : index
    %5 = vector.load %arg3[%c0_4, %c0_5] : memref<1x256xf32, #tpu.memory_space<vmem>>, vector<1x256xf32>
    %6 = vector.broadcast %5 : vector<1x256xf32> to vector<64x256xf32>
    %7 = arith.addf %4, %6 : vector<64x256xf32>
    %c0_6 = arith.constant 0 : index
    %c0_7 = arith.constant 0 : index
    %c0_8 = arith.constant 0 : index
    %8 = vector.load %arg6[%c0_6, %c0_7, %c0_8] : memref<1x64x256xf32, #tpu.memory_space<vmem>>, vector<1x64x256xf32>
    %9 = vector.shape_cast %8 : vector<1x64x256xf32> to vector<64x256xf32>
    %10 = vector.shape_cast %7 : vector<64x256xf32> to vector<1x64x256xf32>
    tpu.vector_store %arg6[%c0_6, %c0_7, %c0_8], %10 {strides = array<i32>} : memref<1x64x256xf32, #tpu.memory_space<vmem>>, vector<1x64x256xf32>,
    %11 = arith.truncf %7 : vector<64x256xf32> to vector<64x256xbf16>
    %c0_9 = arith.constant 0 : index
    %c0_10 = arith.constant 0 : index
    %12 = vector.load %arg4[%c0_9, %c0_10] : memref<256x128xbf16, #tpu.memory_space<vmem>>, vector<256x128xbf16>
    %cst_11 = arith.constant dense<0.000000e+00> : vector<64x128xf32>
    %13 = tpu.matmul %11, %12, %cst_11 {dimension_numbers = #tpu.dot_dimension_numbers<[1], [0], [0], [1], [0, 0, 1, 1], [], []>} : vector<64x256xbf16>, vector<256x128xbf16>, vector<64x128xf32> -> vector<64x128xf32>
    %c0_12 = arith.constant 0 : index
    %c0_13 = arith.constant 0 : index
    %14 = vector.load %arg5[%c0_12, %c0_13] : memref<1x128xf32, #tpu.memory_space<vmem>>, vector<1x128xf32>
    %15 = vector.broadcast %14 : vector<1x128xf32> to vector<64x128xf32>
    %16 = arith.addf %13, %15 : vector<64x128xf32>
    %c0_14 = arith.constant 0 : index
    %c0_15 = arith.constant 0 : index
    %c0_16 = arith.constant 0 : index
    %17 = vector.load %arg7[%c0_14, %c0_15, %c0_16] : memref<1x64x128xf32, #tpu.memory_space<vmem>>, vector<1x64x128xf32>
    %18 = vector.shape_cast %17 : vector<1x64x128xf32> to vector<64x128xf32>
    %19 = vector.shape_cast %16 : vector<64x128xf32> to vector<1x64x128xf32>
    tpu.vector_store %arg7[%c0_14, %c0_15, %c0_16], %19 {strides = array<i32>} : memref<1x64x128xf32, #tpu.memory_space<vmem>>, vector<1x64x128xf32>,
    return
  }
  func.func @transform_0(%arg0: i32) -> (i32, i32, i32) {
    %c0_i32 = arith.constant 0 : i32
    %c0_i32_0 = arith.constant 0 : i32
    %c0_i32_1 = arith.constant 0 : i32
    return %arg0, %c0_i32, %c0_i32_0 : i32, i32, i32
  }
  func.func @transform_1(%arg0: i32) -> (i32, i32) {
    %c0_i32 = arith.constant 0 : i32
    %c0_i32_0 = arith.constant 0 : i32
    %c0_i32_1 = arith.constant 0 : i32
    return %c0_i32, %c0_i32_0 : i32, i32
  }
  func.func @transform_2(%arg0: i32) -> (i32, i32) {
    %c0_i32 = arith.constant 0 : i32
    %c0_i32_0 = arith.constant 0 : i32
    %c0_i32_1 = arith.constant 0 : i32
    return %c0_i32, %c0_i32_0 : i32, i32
  }
  func.func @transform_3(%arg0: i32) -> (i32, i32) {
    %c0_i32 = arith.constant 0 : i32
    %c0_i32_0 = arith.constant 0 : i32
    %c0_i32_1 = arith.constant 0 : i32
    return %c0_i32, %c0_i32_0 : i32, i32
  }
  func.func @transform_4(%arg0: i32) -> (i32, i32) {
    %c0_i32 = arith.constant 0 : i32
    %c0_i32_0 = arith.constant 0 : i32
    %c0_i32_1 = arith.constant 0 : i32
    return %c0_i32, %c0_i32_0 : i32, i32
  }
  func.func @transform_5(%arg0: i32) -> (i32, i32, i32) {
    %c0_i32 = arith.constant 0 : i32
    %c0_i32_0 = arith.constant 0 : i32
    %c0_i32_1 = arith.constant 0 : i32
    return %arg0, %c0_i32, %c0_i32_0 : i32, i32, i32
  }
  func.func @transform_6(%arg0: i32) -> (i32, i32, i32) {
    %c0_i32 = arith.constant 0 : i32
    %c0_i32_0 = arith.constant 0 : i32
    %c0_i32_1 = arith.constant 0 : i32
    return %arg0, %c0_i32, %c0_i32_0 : i32, i32, i32
  }
}

</mosaic_0001>

<bundles_post_ra>
// kernel: tpu_custom_call.1
= control target key start
LH: loop header
LB: loop body
LE: loop exit
PB: predicated region body
PF: predicated region fallthrough
CT: control target
= control target key end

     0   :  { %12 = vsyncpa [#allocation3], 0  ;;  %s1680_s0 = inlined_call_operand.hbm [shape: f32[2,64,128], index: 0, kind: input, shape index: {}]   ;;  %s1681_s1 = inlined_call_operand.hbm [shape: bf16[128,256], index: 1, kind: input, shape index: {}]   ;;  %s1682_s2 = inlined_call_operand.vmem [shape: f32[1,256], index: 2, kind: input, shape index: {}]   ;;  %s1683_s3 = inlined_call_operand.hbm [shape: bf16[256,128], index: 3, kind: input, shape index: {}]   ;;  %s1684_s4 = inlined_call_operand.vmem [shape: f32[1,128], index: 4, kind: input, shape index: {}]   ;;  %s1685_s5 = inlined_call_operand.hbm [shape: f32[2,64,256], index: 5, kind: output, shape index: {0}]   ;;  %s1686_s6 = inlined_call_operand.hbm [shape: f32[2,64,128], index: 6, kind: output, shape index: {1}]  }
   0x1   :  { %14 = vsyncpa [#allocation3 + $0x1], 0 }
   0x2   :  { %15 = vsyncpa [#allocation6], 0 }
   0x3   :  { %16 = vsyncpa [#allocation4], 0 }
   0x4   :  { %18 = vsyncpa [#allocation4 + $0x1], 0 }
   0x5   :  { %19 = vsyncpa [#allocation10], 0 }
   0x6   :  { %21 = vsyncpa [#allocation10 + $0x1], 0  ;;  %s1353_s21 = smov 0   ;;  %s1355_s22 = smov 0  }
   0x7   :  { %s1357_s23 = smov 0   ;;  %s1359_s24 = smov 0  }
   0x8 LB: > { %s1374_s25 = sadd.s32 4294967295, %s1302_s24   ;;  %s895_s26 = sadd.s32 4294967294, %s1302_s24   ;;  %s1302_s24 = sphi %s1359_s24, %s1706_s24   ;;  %s1298_s23 = sphi %s1357_s23, %s1705_s23   ;;  %s1294_s22 = sphi %s1355_s22, %s1704_s22   ;;  %s1290_s21 = sphi %s1353_s21, %s1703_s21  }
   0x9   : > { %p47_p0 = scmp.ne.s32.totalorder %s1294_s22, %s1290_s21  ;;  %p1687_p1 = scmp.eq.s32.totalorder %s1374_s25, 0 }
   0xa   : > { %p161_p3 = scmp.eq.s32.totalorder %s895_s26, 1  ;;  %p896_p5 = scmp.ge.s32.totalorder %s1302_s24, 1 }
   0xb   : > { %p1383_p4 = por %p1687_p1, %p47_p0  ;;  %p194_p7 = scmp.lt.s32.totalorder %s1302_s24, 3 }
   0xc   : > { %p1388_p6 = por %p161_p3, %p47_p0  ;;  %s1304_s30 = smov [#allocation5]  }
   0xd   : > { %s1690_s27 = scalar_select %p1383_p4, 1, 0 }
   0xe   : > { %s1691_s28 = scalar_select %p1388_p6, 1, 0 }
   0xf   : > { %p1393_p8 = pnand %p896_p5, %p194_p7  ;;  %s206_s7 = sshll.u32 %s1304_s30, 4  ;;  %s1397_s7 = int_to_ptr.vmem [resolvable:$true] %s206_s7 }
  0x10   : > { %s1305_s9 = smov [#allocation7]   ;;  %s1114_s13 = scalar_lea.hbm %s1681_s1, 2048 }
  0x11   : > { %p1007_p9 = pneg %p1393_p8  ;;  %s222_s10 = sshll.u32 %s1305_s9, 4  ;;  %s1408_s10 = int_to_ptr.vmem [resolvable:$true] %s222_s10 }
  0x12   : > { %p1115_p12 = scmp.ne.s32.totalorder %s1681_s1, %s1114_s13  ;;  %p1121_p5 = scmp.lt.u32.totalorder %s1114_s13, %s1681_s1 }
  0x13   : > { %p1404_p11 = pnand %p1007_p9, %p1687_p1 }
  0x15   : > { %p1116_p13 = pneg %p1404_p11 }
  0x17   : > { %p1117_p0 = pnand %p1116_p13, %p1115_p12 }
  0x19   : > { %p1118_p3 = pneg %p1117_p0 }
  0x1b   : > { %p1123_p7 = pnand %p1121_p5, %p1118_p3 }
  0x1d   : > { %1126 = shalt.err (!%p1123_p7)
}
  0x1e   : > { %s1127_s18 = scalar_lea.vmem %s1397_s7, 2048  ;;  %p1135_p2 = scmp.lt.s32.totalorder %s1397_s7, %s1397_s7 }
  0x1f   : > { %p1128_p9 = scmp.ne.s32.totalorder %s1397_s7, %s1127_s18  ;;  %p1136_p12 = scmp.lt.s32.totalorder %s1127_s18, %s1127_s18 }
  0x21   : > { %p1130_p10 = pnand %p1128_p9, %p1116_p13  ;;  %p1137_p0 = por %p1136_p12, %p1135_p2 }
  0x23   : > { %p1131_p1 = pneg %p1130_p10 }
  0x25   : > { %p1138_p6 = pnand %p1137_p0, %p1131_p1 }
  0x27   : > { %1141 = shalt.err (!%p1138_p6)
}
  0x28   : > { %s1306_s19 = smov 128   ;;  %s1307_s20 = smov 8  }
  0x29   : > { %1010 = dma.hbm_to_vmem [thread:$0]  (!%p1404_p11), %s1681_s1, 2048, %s1397_s7, [#allocation6], %s1306_s19, %s1306_s19, %s1307_s20  }
  0x2a   : > { %s1142_s12 = scalar_lea.hbm %s1683_s3, 2048 }
  0x2b   : > { %p1143_p1 = scmp.ne.s32.totalorder %s1683_s3, %s1142_s12  ;;  %p1149_p10 = scmp.lt.u32.totalorder %s1142_s12, %s1683_s3 }
  0x2d   : > { %p1145_p2 = pnand %p1143_p1, %p1116_p13 }
  0x2f   : > { %p1146_p6 = pneg %p1145_p2 }
  0x31   : > { %p1151_p3 = pnand %p1149_p10, %p1146_p6 }
  0x33   : > { %1154 = shalt.err (!%p1151_p3)
}
  0x34   : > { %s1155_s7 = scalar_lea.vmem %s1408_s10, 2048  ;;  %p1163_p12 = scmp.lt.s32.totalorder %s1408_s10, %s1408_s10 }
  0x35   : > { %p1156_p5 = scmp.ne.s32.totalorder %s1408_s10, %s1155_s7  ;;  %p1164_p0 = scmp.lt.s32.totalorder %s1155_s7, %s1155_s7 }
  0x37   : > { %p1158_p7 = pnand %p1156_p5, %p1116_p13  ;;  %p1165_p1 = por %p1164_p0, %p1163_p12 }
  0x39   : > { %p1159_p9 = pneg %p1158_p7 }
  0x3b   : > { %p1166_p2 = pnand %p1165_p1, %p1159_p9 }
  0x3d   : > { %1169 = shalt.err (!%p1166_p2)
}
  0x3e   : > { %s1308_s17 = smov 64   ;;  %s1309_s18 = smov 4  }
  0x3f   : > { %1013 = dma.hbm_to_vmem [thread:$0]  (!%p1404_p11), %s1683_s3, 2048, %s1408_s10, [#allocation6], %s1308_s17, %s1308_s17, %s1309_s18  }
  0x40   : > { %s1466_s9 = sadd.s32 1, %s1302_s24   ;;  %s34_s12 = sadd.s32 1, %s1298_s23 }
  0x41   : > { %s31_s11 = ssub.s32 %s1302_s24, %s1466_s9  ;;  %p41_p6 = scmp.ne.s32.totalorder %s1298_s23, %s1294_s22 }
  0x42   : > { %p32_p13 = scmp.eq.s32.totalorder %s31_s11, 0  ;;  %p42_p10 = scmp.eq.s32.totalorder %s1302_s24, 0 }
  0x43   : > { %p1694_p5 = scmp.eq.s32.totalorder %s1374_s25, 1  ;;  %p1027_p9 = scmp.lt.s32.totalorder %s1302_s24, 2 }
  0x44   : > { %s1475_s13 = scalar_select %p32_p13, %s1298_s23, %s34_s12  }
  0x45   : > { %p43_p3 = por %p42_p10, %p41_p6  ;;  %p1479_p7 = por %p1694_p5, %p41_p6 }
  0x46   : > { %s239_s8 = sand.u32 1, %s1298_s23   ;;  %s950_s10 = sshll.u32 %s1302_s24, 10 }
  0x47   : > { %s1695_s14 = scalar_select %p1479_p7, 1, 0 }
  0x48   : > { %s900_s15 = sshll.u32 %s239_s8, 6  ;;  %s1489_s17 = scalar_lea.hbm %s1680_s0, %s950_s10 }
  0x49   : > { %s243_s18 = scalar_lea.vmem [#allocation2], %s900_s15  ;;  %p1493_p11 = pnand %p1027_p9, %p43_p3 }
  0x4a   : > { %s250_s26 = sshll.u32 %s243_s18, 4  ;;  %s1497_s11 = scalar_lea.sflag [#allocation3], %s239_s8  ;;  %s1491_s26 = int_to_ptr.vmem [resolvable:$true] %s250_s26 }
  0x4b   : > { %s1170_s12 = scalar_lea.hbm %s1489_s17, 1024  ;;  %p1172_p0 = pneg %p1493_p11 }
  0x4c   : > { %p1171_p12 = scmp.ne.s32.totalorder %s1489_s17, %s1170_s12  ;;  %s1175_s16 = scalar_lea.hbm %s1680_s0, 2048 }
  0x4d   : > { %p1176_p13 = scmp.lt.u32.totalorder %s1489_s17, %s1680_s0  ;;  %p1177_p6 = scmp.lt.u32.totalorder %s1175_s16, %s1170_s12 }
  0x4e   : > { %p1173_p1 = pnand %p1172_p0, %p1171_p12  ;;  %p1179_p3 = scmp.lt.u32.totalorder %s1170_s12, %s1489_s17 }
  0x4f   : > { %p1178_p10 = por %p1177_p6, %p1176_p13 }
  0x50   : > { %p1174_p2 = pneg %p1173_p1 }
  0x51   : > { %p1180_p5 = por %p1179_p3, %p1178_p10 }
  0x53   : > { %p1181_p9 = pnand %p1180_p5, %p1174_p2 }
  0x55   : > { %1184 = shalt.err (!%p1181_p9)
}
  0x56   : > { %s1185_s8 = scalar_lea.vmem %s1491_s26, 1024  ;;  %s1310_s15 = smov [#allocation2]  }
  0x57   : > { %p1186_p12 = scmp.ne.s32.totalorder %s1491_s26, %s1185_s8  ;;  %s1190_s10 = sshll.u32 %s1310_s15, 4  ;;  %s1191_s10 = int_to_ptr.vmem [resolvable:$false] %s1190_s10 }
  0x58   : > { %s1192_s7 = scalar_lea.vmem %s1191_s10, 2048  ;;  %p1193_p4 = scmp.lt.s32.totalorder %s1491_s26, %s1191_s10 }
  0x59   : > { %p1188_p1 = pnand %p1186_p12, %p1172_p0  ;;  %p1194_p13 = scmp.lt.s32.totalorder %s1192_s7, %s1185_s8 }
  0x5b   : > { %p1189_p7 = pneg %p1188_p1  ;;  %p1195_p6 = por %p1194_p13, %p1193_p4 }
  0x5d   : > { %p1196_p10 = pnand %p1195_p6, %p1189_p7 }
  0x5f   : > { %1199 = shalt.err (!%p1196_p10)
}
  0x60   : > { %1017 = dma.hbm_to_vmem [thread:$0]  (!%p1493_p11), %s1489_s17, 1024, %s1491_s26, %s1497_s11, %s1306_s19, %s1306_s19, %s1307_s20  }
  0x61   : > { %262 = sbr.rel (%p1393_p8) target bundleno = 619 (0x26b), region = 40  ;;  %s1531_s12 = sand.u32 (!%p1393_p8), 1, %s1294_s22  }
  0x62   : > { %s904_s16 = sshll.u32 (!%p1393_p8), %s1531_s12, 6  ;;  %s265_s18 = scalar_lea.sflag (!%p1393_p8), [#allocation3], %s1531_s12 }
  0x63   : > { %s1537_s30 = scalar_lea.vmem (!%p1393_p8), [#allocation2], %s904_s16  ;;  %p1697_p4 = scmp.ne.s32.totalorder (!%p1393_p8), %s1690_s27, 0 }
  0x68   : > { %1273 = dma.done.wait (%p1697_p4), %s265_s18, 1024  }
  0x69   : > { %1275 = vsyncadd (%p1697_p4), %s265_s18, 4294966272  ;;  %p1698_p7 = scmp.eq.s32.totalorder %s1374_s25, 0 }
  0x6b   : > { %1277 = dma.done.wait (%p1698_p7), [#allocation6], 4096   ;;  %p1699_p8 = pmov %p1698_p7 }
  0x6c   : > { %v1311_v0 = vmov 0   ;;  %v1074_v1 = vld [vmem:[#allocation5 + $0x4] ss:$8 sps:$4 sm:$0xff]   ;;  %v1076_v2 = vld [vmem:[#allocation5] ss:$8 sps:$4 sm:$0xff]   ;;  %v1102_v16 = vld [vmem:[#allocation7 + $0x50] sm:$0xff]   ;;  %v341_v45 = vlaneseq }
  0x6d   : > { %1279 = vsyncadd (%p1699_p8), [#allocation6], 4294963200  ;;  %463 = vmatprep.mubr.bf16.mxu0 %v1311_v0  ;;  %431 = vmatprep.subr.bf16.mxu0 %v1074_v1  ;;  %v1077_v3 = vld [vmem:[#allocation5 + $0x14] ss:$8 sps:$4 sm:$0xff]   ;;  %v1079_v4 = vld [vmem:[#allocation5 + $0x10] ss:$8 sps:$4 sm:$0xff]  }
  0x6e   : > { %432 = vmatpush1.bf16.msra.mxu0 %v1076_v2  ;;  %v1080_v5 = vld [vmem:[#allocation5 + $0x24] ss:$8 sps:$4 sm:$0xff]   ;;  %v1082_v6 = vld [vmem:[#allocation5 + $0x20] ss:$8 sps:$4 sm:$0xff]   ;;  %v1083_v7 = vld [vmem:[#allocation5 + $0x34] ss:$8 sps:$4 sm:$0xff]  }
  0x6f   : > { %433 = vmatprep.subr.bf16.mxu0 %v1077_v3  ;;  %v1085_v8 = vld [vmem:[#allocation5 + $0x30] ss:$8 sps:$4 sm:$0xff]   ;;  %v1086_v9 = vld [vmem:[#allocation5 + $0x44] ss:$8 sps:$4 sm:$0xff]   ;;  %v1088_v10 = vld [vmem:[#allocation5 + $0x40] ss:$8 sps:$4 sm:$0xff]  }
  0x70   : > { %v1089_v11 = vld [vmem:[#allocation5 + $0x54] ss:$8 sps:$4 sm:$0xff]   ;;  %v1098_v12 = vld [vmem:[#allocation7 + $0x40] sm:$0xff]   ;;  %v1100_v14 = vld [vmem:[#allocation7 + $0x48] sm:$0xff]   ;;  %v342_v46 = vshrl.u32 %v341_v45, 7  ;;  %s907_s19 = sshll.u32 %s1531_s12, 7 }
  0x71   : > { %v1099_v13 = vld [vmem:[#allocation7] sm:$0xff]   ;;  %953 = vmatprep.subr.bf16.mxu1 %v1098_v12  ;;  %v1101_v15 = vld [vmem:[#allocation7 + $0x8] sm:$0xff]   ;;  %v1091_v17 = vld [vmem:[#allocation5 + $0x50] ss:$8 sps:$4 sm:$0xff]   ;;  %s1563_s20 = scalar_lea.vmem [#allocation8], %s907_s19  ;;  %s951_s17 = sshll.u32 %s1374_s25, 11 }
  0x72   : > { %434 = vmatpush1.bf16.msra.mxu0 %v1079_v4  ;;  %954 = vmatpush3.bf16.msra.mxu1 %v1099_v13  ;;  %v1092_v18 = vld [vmem:[#allocation5 + $0x64] ss:$8 sps:$4 sm:$0xff]   ;;  %v1103_v19 = vld [vmem:[#allocation7 + $0x10] sm:$0xff]   ;;  %v1104_v20 = vld [vmem:[#allocation7 + $0x58] sm:$0xff]   ;;  %v343_v47 = vsub.s32 0, %v342_v46  ;;  %v347_v49 = vsub.s32 1, %v342_v46  ;;  %s1586_s15 = scalar_lea.hbm %s1685_s5, %s951_s17 }
  0x73   : > { %435 = vmatprep.subr.bf16.mxu0 %v1080_v5  ;;  %955 = vmatprep.subr.bf16.mxu1 %v1100_v14  ;;  %v1094_v21 = vld [vmem:[#allocation5 + $0x60] ss:$8 sps:$4 sm:$0xff]   ;;  %v1095_v22 = vld [vmem:[#allocation5 + $0x74] ss:$8 sps:$4 sm:$0xff]   ;;  %v1097_v23 = vld [vmem:[#allocation5 + $0x70] ss:$8 sps:$4 sm:$0xff]  }
  0x74   : > { %v311_v24 = vld [vmem:[%s1537_s30] sm:$0xff]  ;;  %v312_v25 = vld [vmem:[%s1537_s30 + $0x8] sm:$0xff]  ;;  %v1105_v26 = vld [vmem:[#allocation7 + $0x18] sm:$0xff]   ;;  %s755_s26 = sshll.u32 %s1563_s20, 4  ;;  %s737_s10 = scalar_lea.sflag [#allocation4], %s1531_s12  ;;  %s1588_s26 = int_to_ptr.vmem [resolvable:$true] %s755_s26 }
  0x75   : > { %v1106_v27 = vld [vmem:[#allocation7 + $0x60] sm:$0xff]   ;;  %v319_v29 = vpack.c.bf16 %v312_v25, %v311_v24  ;;  %v1108_v30 = vld [vmem:[#allocation7 + $0x68] sm:$0xff]   ;;  %v313_v32 = vld [vmem:[%s1537_s30 + $0x10] sm:$0xff]  ;;  %s1200_s7 = scalar_lea.vmem %s1588_s26, 2048  ;;  %p1700_p0 = scmp.ne.s32.totalorder %s1695_s14, 0 }
  0x76   : > { %436 = vmatpush1.bf16.msra.mxu0 %v1082_v6  ;;  %956 = vmatpush3.bf16.msra.mxu1 %v1101_v15  ;;  %v1107_v28 = vld [vmem:[#allocation7 + $0x20] sm:$0xff]   ;;  %v1109_v31 = vld [vmem:[#allocation7 + $0x28] sm:$0xff]   ;;  %v314_v33 = vld [vmem:[%s1537_s30 + $0x18] sm:$0xff]  ;;  %p1201_p11 = scmp.ne.s32.totalorder %s1588_s26, %s1200_s7  ;;  %s1312_s18 = smov [#allocation8]  }
  0x77   : > { %437 = vmatprep.subr.bf16.mxu0 %v1083_v7  ;;  %957 = vmatprep.subr.bf16.mxu1 %v1102_v16  ;;  %v320_v34 = vpack.c.bf16 %v314_v33, %v313_v32  ;;  %v315_v35 = vld [vmem:[%s1537_s30 + $0x20] sm:$0xff]  ;;  %v316_v36 = vld [vmem:[%s1537_s30 + $0x28] sm:$0xff]  ;;  %v317_v38 = vld [vmem:[%s1537_s30 + $0x30] sm:$0xff] }
  0x78   : > { %v321_v37 = vpack.c.bf16 %v316_v36, %v315_v35  ;;  %v318_v39 = vld [vmem:[%s1537_s30 + $0x38] sm:$0xff]  ;;  %v1110_v41 = vld [vmem:[#allocation7 + $0x70] sm:$0xff]   ;;  %v339_v48 = vld [vmem:[%s1682_s2] sm:$0x3]  ;;  %p1202_p2 = pnand %p1201_p11, %p1700_p0  ;;  %s1204_s30 = sshll.u32 %s1312_s18, 4  ;;  %s1205_s30 = int_to_ptr.vmem [resolvable:$false] %s1204_s30 }
  0x79   : > { %v322_v40 = vpack.c.bf16 %v318_v39, %v317_v38  ;;  %v1111_v42 = vld [vmem:[#allocation7 + $0x30] sm:$0xff]   ;;  %v1112_v43 = vld [vmem:[#allocation7 + $0x78] sm:$0xff]   ;;  %v344_v50 = vrot.slane %v339_v48, %v343_v47  ;;  %v348_v51 = vrot.slane %v339_v48, %v347_v49  ;;  %s1206_s27 = scalar_lea.vmem %s1205_s30, 4096  ;;  %p1207_p5 = scmp.lt.s32.totalorder %s1588_s26, %s1205_s30 }
  0x7a   : > { %438 = vmatpush1.bf16.msra.mxu0 %v1085_v8  ;;  %958 = vmatpush3.bf16.msra.mxu1 %v1103_v19  ;;  %v1113_v44 = vld [vmem:[#allocation7 + $0x38] sm:$0xff]   ;;  %p1203_p3 = pneg %p1202_p2  ;;  %p1208_p9 = scmp.lt.s32.totalorder %s1206_s27, %s1200_s7 }
  0x7b   : > { %439 = vmatprep.subr.bf16.mxu0 %v1086_v9  ;;  %959 = vmatprep.subr.bf16.mxu1 %v1104_v20 }
  0x7c   : > { %p1209_p12 = por %p1208_p9, %p1207_p5 }
  0x7e   : > { %440 = vmatpush1.bf16.msra.mxu0 %v1088_v10  ;;  %960 = vmatpush3.bf16.msra.mxu1 %v1105_v26  ;;  %p1210_p1 = pnand %p1209_p12, %p1203_p3 }
  0x7f   : > { %441 = vmatprep.subr.bf16.mxu0 %v1089_v11  ;;  %961 = vmatprep.subr.bf16.mxu1 %v1106_v27 }
  0x82   : > { %442 = vmatpush1.bf16.msra.mxu0 %v1091_v17  ;;  %962 = vmatpush3.bf16.msra.mxu1 %v1107_v28 }
  0x83   : > { %443 = vmatprep.subr.bf16.mxu0 %v1092_v18  ;;  %963 = vmatprep.subr.bf16.mxu1 %v1108_v30 }
  0x86   : > { %444 = vmatpush1.bf16.msra.mxu0 %v1094_v21  ;;  %964 = vmatpush3.bf16.msra.mxu1 %v1109_v31 }
  0x87   : > { %445 = vmatprep.subr.bf16.mxu0 %v1095_v22  ;;  %965 = vmatprep.subr.bf16.mxu1 %v1110_v41 }
  0x8a   : > { %446 = vmatpush1.bf16.msra.mxu0 %v1097_v23  ;;  %966 = vmatpush3.bf16.msra.mxu1 %v1111_v42 }
  0x8b   : > { %967 = vmatprep.subr.bf16.mxu1 %v1112_v43 }
  0x8d   : > { %464 = vmatmul.mubr.bf16.vlgmr.msra.gmra.mrb[0].mxu0 %v319_v29 }
  0x8e   : > { %473 = vmatprep.mubr.bf16.mxu0 %v1311_v0  ;;  %968 = vmatpush3.bf16.msra.mxu1 %v1113_v44 }
  0x95   : > { %474 = vmatmul.mubr.bf16.gmra.mrb[4].mxu0 %v320_v34 }
  0x96   : > { %483 = vmatprep.mubr.bf16.mxu0 %v1311_v0 }
  0x9d   : > { %484 = vmatmul.mubr.bf16.gmra.mrb[8].mxu0 %v321_v37 }
  0x9e   : > { %493 = vmatprep.mubr.bf16.mxu0 %v1311_v0 }
  0xa5   : > { %494 = vmatmul.mubr.bf16.gmra.mrb[12].mxu0 %v322_v40 }
 0x160   : > { %v465_v52 = vpop.f32.mrb[0].mxu0 }
 0x161   : > { %v466_v53 = vadd.f32 %v465_v52, %v344_v50  ;;  %v467_v54 = vpop.f32.mrb[1].mxu0 }
 0x162   : > { %v468_v55 = vadd.f32 %v467_v54, %v348_v51  ;;  %v469_v56 = vpop.f32.mrb[2].mxu0 }
 0x163   : > { %504 = vst [vmem:[%s1563_s20] sm:$0xff] %v466_v53  ;;  %v470_v57 = vadd.f32 %v469_v56, %v344_v50  ;;  %v471_v58 = vpop.f32.mrb[3].mxu0 }
 0x164   : > { %505 = vst [vmem:[%s1563_s20 + $0x8] sm:$0xff] %v468_v55  ;;  %v472_v59 = vadd.f32 %v471_v58, %v348_v51 }
 0x165   : > { %506 = vst [vmem:[%s1563_s20 + $0x10] sm:$0xff] %v470_v57  ;;  %v520_v60 = vpack.c.bf16 %v470_v57, %v466_v53 }
 0x166   : > { %507 = vst [vmem:[%s1563_s20 + $0x18] sm:$0xff] %v472_v59  ;;  %v521_v61 = vpack.c.bf16 %v472_v59, %v468_v55 }
 0x168   : > { %v475_v62 = vpop.f32.mrb[4].mxu0  ;;  %695 = vmatprep.mubr.bf16.mxu1 %v521_v61 }
 0x169   : > { %v476_v63 = vadd.f32 %v475_v62, %v344_v50  ;;  %v477_v0 = vpop.f32.mrb[5].mxu0  ;;  %696 = vmatmul.mubr.bf16.vlgmr.msra.gmra.mrb[0].mxu1 %v520_v60 }
 0x16a   : > { %v478_v1 = vadd.f32 %v477_v0, %v348_v51  ;;  %v479_v2 = vpop.f32.mrb[6].mxu0 }
 0x16b   : > { %508 = vst [vmem:[%s1563_s20 + $0x20] sm:$0xff] %v476_v63  ;;  %v480_v3 = vadd.f32 %v479_v2, %v344_v50  ;;  %v481_v4 = vpop.f32.mrb[7].mxu0 }
 0x16c   : > { %509 = vst [vmem:[%s1563_s20 + $0x28] sm:$0xff] %v478_v1  ;;  %v482_v5 = vadd.f32 %v481_v4, %v348_v51 }
 0x16d   : > { %510 = vst [vmem:[%s1563_s20 + $0x30] sm:$0xff] %v480_v3  ;;  %v522_v6 = vpack.c.bf16 %v480_v3, %v476_v63 }
 0x16e   : > { %511 = vst [vmem:[%s1563_s20 + $0x38] sm:$0xff] %v482_v5  ;;  %v523_v7 = vpack.c.bf16 %v482_v5, %v478_v1 }
 0x170   : > { %v485_v8 = vpop.f32.mrb[8].mxu0  ;;  %703 = vmatprep.mubr.bf16.mxu1 %v523_v7 }
 0x171   : > { %v486_v9 = vadd.f32 %v485_v8, %v344_v50  ;;  %v487_v10 = vpop.f32.mrb[9].mxu0  ;;  %704 = vmatmul.mubr.bf16.gmra.mrb[4].mxu1 %v522_v6 }
 0x172   : > { %v488_v11 = vadd.f32 %v487_v10, %v348_v51  ;;  %v489_v12 = vpop.f32.mrb[10].mxu0 }
 0x173   : > { %512 = vst [vmem:[%s1563_s20 + $0x40] sm:$0xff] %v486_v9  ;;  %v490_v13 = vadd.f32 %v489_v12, %v344_v50  ;;  %v491_v14 = vpop.f32.mrb[11].mxu0 }
 0x174   : > { %513 = vst [vmem:[%s1563_s20 + $0x48] sm:$0xff] %v488_v11  ;;  %v492_v15 = vadd.f32 %v491_v14, %v348_v51 }
 0x175   : > { %514 = vst [vmem:[%s1563_s20 + $0x50] sm:$0xff] %v490_v13  ;;  %v524_v16 = vpack.c.bf16 %v490_v13, %v486_v9 }
 0x176   : > { %515 = vst [vmem:[%s1563_s20 + $0x58] sm:$0xff] %v492_v15  ;;  %v525_v17 = vpack.c.bf16 %v492_v15, %v488_v11 }
 0x178   : > { %v495_v18 = vpop.f32.mrb[12].mxu0  ;;  %711 = vmatprep.mubr.bf16.mxu1 %v525_v17 }
 0x179   : > { %v496_v19 = vadd.f32 %v495_v18, %v344_v50  ;;  %v497_v20 = vpop.f32.mrb[13].mxu0  ;;  %712 = vmatmul.mubr.bf16.gmra.mrb[8].mxu1 %v524_v16 }
 0x17a   : > { %v498_v21 = vadd.f32 %v497_v20, %v348_v51  ;;  %v499_v22 = vpop.f32.mrb[14].mxu0 }
 0x17b   : > { %516 = vst [vmem:[%s1563_s20 + $0x60] sm:$0xff] %v496_v19  ;;  %v500_v23 = vadd.f32 %v499_v22, %v344_v50  ;;  %v501_v24 = vpop.f32.mrb[15].mxu0 }
 0x17c   : > { %517 = vst [vmem:[%s1563_s20 + $0x68] sm:$0xff] %v498_v21  ;;  %v502_v25 = vadd.f32 %v501_v24, %v348_v51 }
 0x17d   : > { %518 = vst [vmem:[%s1563_s20 + $0x70] sm:$0xff] %v500_v23  ;;  %v526_v26 = vpack.c.bf16 %v500_v23, %v496_v19 }
 0x17e   : > { %519 = vst [vmem:[%s1563_s20 + $0x78] sm:$0xff] %v502_v25  ;;  %v527_v27 = vpack.c.bf16 %v502_v25, %v498_v21 }
 0x180   : > { %719 = vmatprep.mubr.bf16.mxu1 %v527_v27 }
 0x181   : > { %720 = vmatmul.mubr.bf16.gmra.mrb[12].mxu1 %v526_v26 }
 0x182   : > { %1213 = shalt.err (!%p1210_p1)
}
 0x183   : > { %s1214_s29 = scalar_lea.hbm %s1586_s15, 2048  ;;  %s1218_s17 = scalar_lea.hbm %s1685_s5, 4096 }
 0x184   : > { %p1215_p13 = scmp.ne.s32.totalorder %s1586_s15, %s1214_s29  ;;  %p1219_p4 = scmp.lt.u32.totalorder %s1586_s15, %s1685_s5 }
 0x185   : > { %p1220_p7 = scmp.lt.u32.totalorder %s1218_s17, %s1214_s29  ;;  %p1222_p11 = scmp.lt.u32.totalorder %s1214_s29, %s1586_s15 }
 0x186   : > { %p1216_p6 = pnand %p1215_p13, %p1700_p0 }
 0x187   : > { %p1221_p8 = por %p1220_p7, %p1219_p4 }
 0x188   : > { %p1217_p10 = pneg %p1216_p6 }
 0x189   : > { %p1223_p2 = por %p1222_p11, %p1221_p8 }
 0x18b   : > { %p1224_p3 = pnand %p1223_p2, %p1217_p10 }
 0x18d   : > { %1227 = shalt.err (!%p1224_p3)
}
 0x18e   : > { %s1313_s7 = smov 256   ;;  %s1314_s18 = smov 16   ;;  %v925_v29 = vld [vmem:[%s1684_s4] ss:$0 sm:$0xff] }
 0x18f   : > { %1003 = dma.vmem_to_hbm [thread:$0]  (%p1700_p0), %s1588_s26, 2048, %s1586_s15, %s737_s10, %s1313_s7, %s1313_s7, %s1314_s18  }
 0x190   : > { %s1619_s29 = scalar_lea.vmem [#allocation9], %s904_s16  ;;  %s952_s26 = sshll.u32 %s1374_s25, 10 }
 0x191   : > { %s771_s16 = sshll.u32 %s1619_s29, 4  ;;  %s1635_s19 = scalar_lea.hbm %s1686_s6, %s952_s26  ;;  %s1629_s16 = int_to_ptr.vmem [resolvable:$true] %s771_s16 }
 0x192   : > { %s742_s20 = scalar_lea.sflag [#allocation10], %s1531_s12  ;;  %s1228_s17 = scalar_lea.vmem %s1629_s16, 1024 }
 0x193   : > { %p1229_p5 = scmp.ne.s32.totalorder %s1629_s16, %s1228_s17  ;;  %s1315_s25 = smov [#allocation9]  }
 0x194   : > { %s1232_s11 = sshll.u32 %s1315_s25, 4  ;;  %s1233_s11 = int_to_ptr.vmem [resolvable:$false] %s1232_s11 }
 0x195   : > { %p1230_p9 = pnand %p1229_p5, %p1700_p0  ;;  %s1234_s8 = scalar_lea.vmem %s1233_s11, 2048 }
 0x196   : > { %p1235_p1 = scmp.lt.s32.totalorder %s1629_s16, %s1233_s11  ;;  %p1236_p13 = scmp.lt.s32.totalorder %s1234_s8, %s1228_s17 }
 0x197   : > { %p1231_p12 = pneg %p1230_p9 }
 0x198   : > { %p1237_p6 = por %p1236_p13, %p1235_p1 }
 0x19a   : > { %p1238_p10 = pnand %p1237_p6, %p1231_p12 }
 0x23c   : > { %v969_v28 = vpop.f32.mrb[0].mxu1 }
 0x23d   : > { %v970_v30 = vpop.f32.mrb[1].mxu1 }
 0x23e   : > { %v971_v31 = vadd.f32 %v970_v30, %v969_v28  ;;  %v972_v32 = vpop.f32.mrb[2].mxu1 }
 0x23f   : > { %v973_v33 = vpop.f32.mrb[3].mxu1 }
 0x240   : > { %v698_v34 = vadd.f32 %v971_v31, %v925_v29  ;;  %v974_v35 = vadd.f32 %v973_v33, %v972_v32 }
 0x242   : > { %728 = vst [vmem:[%s1619_s29] sm:$0xff] %v698_v34  ;;  %v701_v36 = vadd.f32 %v974_v35, %v925_v29 }
 0x244   : > { %729 = vst [vmem:[%s1619_s29 + $0x8] sm:$0xff] %v701_v36  ;;  %v975_v37 = vpop.f32.mrb[4].mxu1 }
 0x245   : > { %v976_v38 = vpop.f32.mrb[5].mxu1 }
 0x246   : > { %v977_v39 = vadd.f32 %v976_v38, %v975_v37  ;;  %v978_v40 = vpop.f32.mrb[6].mxu1 }
 0x247   : > { %v979_v41 = vpop.f32.mrb[7].mxu1 }
 0x248   : > { %v706_v42 = vadd.f32 %v977_v39, %v925_v29  ;;  %v980_v43 = vadd.f32 %v979_v41, %v978_v40 }
 0x24a   : > { %730 = vst [vmem:[%s1619_s29 + $0x10] sm:$0xff] %v706_v42  ;;  %v709_v44 = vadd.f32 %v980_v43, %v925_v29 }
 0x24c   : > { %731 = vst [vmem:[%s1619_s29 + $0x18] sm:$0xff] %v709_v44  ;;  %v981_v45 = vpop.f32.mrb[8].mxu1 }
 0x24d   : > { %v982_v46 = vpop.f32.mrb[9].mxu1 }
 0x24e   : > { %v983_v47 = vadd.f32 %v982_v46, %v981_v45  ;;  %v984_v48 = vpop.f32.mrb[10].mxu1 }
 0x24f   : > { %v985_v49 = vpop.f32.mrb[11].mxu1 }
 0x250   : > { %v714_v50 = vadd.f32 %v983_v47, %v925_v29  ;;  %v986_v51 = vadd.f32 %v985_v49, %v984_v48 }
 0x252   : > { %732 = vst [vmem:[%s1619_s29 + $0x20] sm:$0xff] %v714_v50  ;;  %v717_v52 = vadd.f32 %v986_v51, %v925_v29 }
 0x254   : > { %733 = vst [vmem:[%s1619_s29 + $0x28] sm:$0xff] %v717_v52  ;;  %v987_v53 = vpop.f32.mrb[12].mxu1 }
 0x255   : > { %v988_v54 = vpop.f32.mrb[13].mxu1 }
 0x256   : > { %v989_v55 = vadd.f32 %v988_v54, %v987_v53  ;;  %v990_v56 = vpop.f32.mrb[14].mxu1 }
 0x257   : > { %v991_v57 = vpop.f32.mrb[15].mxu1 }
 0x258   : > { %v722_v58 = vadd.f32 %v989_v55, %v925_v29  ;;  %v992_v59 = vadd.f32 %v991_v57, %v990_v56 }
 0x25a   : > { %734 = vst [vmem:[%s1619_s29 + $0x30] sm:$0xff] %v722_v58  ;;  %v725_v60 = vadd.f32 %v992_v59, %v925_v29 }
 0x25c   : > { %735 = vst [vmem:[%s1619_s29 + $0x38] sm:$0xff] %v725_v60 }
 0x25d   : > { %1241 = shalt.err (!%p1238_p10)
}
 0x25e   : > { %s1242_s7 = scalar_lea.hbm %s1635_s19, 1024  ;;  %s1246_s27 = scalar_lea.hbm %s1686_s6, 2048 }
 0x25f   : > { %p1243_p4 = scmp.ne.s32.totalorder %s1635_s19, %s1242_s7  ;;  %p1247_p11 = scmp.lt.u32.totalorder %s1635_s19, %s1686_s6 }
 0x260   : > { %p1248_p2 = scmp.lt.u32.totalorder %s1246_s27, %s1242_s7  ;;  %p1250_p5 = scmp.lt.u32.totalorder %s1242_s7, %s1635_s19 }
 0x261   : > { %p1244_p7 = pnand %p1243_p4, %p1700_p0 }
 0x262   : > { %p1249_p3 = por %p1248_p2, %p1247_p11 }
 0x263   : > { %p1245_p8 = pneg %p1244_p7 }
 0x264   : > { %p1251_p9 = por %p1250_p5, %p1249_p3 }
 0x266   : > { %p1252_p12 = pnand %p1251_p9, %p1245_p8 }
 0x268   : > { %1255 = shalt.err (!%p1252_p12)
}
 0x269   : > { %s1316_s15 = smov 128   ;;  %s1317_s10 = smov 8  }
 0x26a   : > { %1004 = dma.vmem_to_hbm [thread:$0]  (%p1700_p0), %s1629_s16, 1024, %s1635_s19, %s742_s20, %s1316_s15, %s1316_s15, %s1317_s10  }
 0x26b PF: > { %s786_s17 = sand.u32 1, %s1290_s21   ;;  %p1701_p1 = scmp.ne.s32.totalorder %s1691_s28, 0 }
 0x26c   : > { %p1702_p13 = scmp.ge.s32.totalorder %s1302_s24, 2  ;;  %s787_s25 = scalar_lea.sflag [#allocation4], %s786_s17 }
 0x26e   : > { %p1019_p6 = pnand %p1702_p13, %p1701_p1 }
 0x270   : > { %1281 = dma.done.wait (!%p1019_p6), %s787_s25, 2048  }
 0x271   : > { %1283 = vsyncadd (!%p1019_p6), %s787_s25, 4294965248  ;;  %s796_s11 = scalar_lea.sflag [#allocation10], %s786_s17 }
 0x272   : > { %1285 = dma.done.wait (!%p1019_p6), %s796_s11, 1024  }
 0x273   : > { %1287 = vsyncadd (!%p1019_p6), %s796_s11, 4294966272  ;;  %p24_p0 = scmp.ge.s32.totalorder %s1466_s9, 4   ;;  %s1703_s21 = smov %s1294_s22 }
 0x274   : > { %s1704_s22 = smov %s1298_s23  ;;  %s1705_s23 = smov %s1475_s13 }
 0x275   : > { %s1706_s24 = smov %s1466_s9  ;;  %26 = sbr.rel (!%p24_p0) target bundleno = 8 (0x8), region = 110 }
 0x27c   :  { %801 = vsyncpa [#allocation3], 1 }
 0x27d   :  { %803 = vsyncpa [#allocation3 + $0x1], 1 }
 0x27e   :  { %804 = vsyncpa [#allocation6], 1 }
 0x27f   :  { %805 = vsyncpa [#allocation4], 1 }
 0x280   :  { %807 = vsyncpa [#allocation4 + $0x1], 1 }
 0x281   :  { %808 = vsyncpa [#allocation10], 1 }
 0x282   :  { %810 = vsyncpa [#allocation10 + $0x1], 1 }

</bundles_post_ra>
